<compile_context>
chip_gen: v5e
topology: v5e:2x2
jax: 0.10.0
libtpu: 0.0.40
codegen_flags: <defaults>
</compile_context>

<pallas_src>
import jax
import jax.numpy as jnp
from jax.experimental import pallas as pl
from jax.experimental.pallas import tpu as pltpu

_SMALL_COPY_BYTES = 4 * 1024 * 1024      # below this, plain XLA copy wins (dispatch-bound)
_CHUNK_SPLIT_BYTES = 256 * 1024 * 1024   # above this, split into concurrent DMAs (v7x HBM)
_MAX_DMA_CHUNKS = 4


def _make_hbm_copy_kernel(n_chunks: int, chunk_rows: int):
    """Kernel: copy the whole input to the output via direct HBM->HBM DMA(s)."""

    def kernel(x_hbm_ref, o_hbm_ref, sems):
        if n_chunks == 1:
            cp = pltpu.make_async_copy(x_hbm_ref, o_hbm_ref, sems.at[0])
            cp.start()
            cp.wait()
        else:
            # Multiple concurrent in-flight DMAs along the leading axis
            # (start all, then wait all) to better drive HBM for huge copies.
            copies = []
            for i in range(n_chunks):
                sl = pl.ds(i * chunk_rows, chunk_rows)
                cp = pltpu.make_async_copy(
                    x_hbm_ref.at[sl], o_hbm_ref.at[sl], sems.at[i]
                )
                cp.start()
                copies.append(cp)
            for cp in copies:
                cp.wait()

    return kernel


def _pick_chunks(x: jax.Array) -> tuple[int, int]:
    """Number of concurrent DMA chunks and rows-per-chunk along axis 0."""
    if x.ndim == 0 or x.nbytes < _CHUNK_SPLIT_BYTES:
        return 1, 0
    lead = x.shape[0]
    for n in (_MAX_DMA_CHUNKS, 2):
        if lead % n == 0:
            return n, lead // n
    return 1, 0


def _pallas_hbm_copy(
    x: jax.Array,
    *,
    min_pallas_bytes: int = _SMALL_COPY_BYTES,
    n_chunks: int | None = None,
) -> jax.Array:
    """Materialize a distinct copy of `x`.

    Small tensors use a plain XLA copy (no custom-call overhead); large tensors
    use a Pallas whole-array HBM->HBM DMA (optionally split into concurrent
    chunks along the leading axis).
    """
    if x.size == 0:
        # Fresh (empty) buffer — consistent "distinct buffer" semantics.
        return jnp.copy(x)
    if x.nbytes < min_pallas_bytes:
        # XLA-level copy: fusable / aliasable, no custom-call dispatch cost.
        return jnp.copy(x)

    if n_chunks is None:
        n_chunks, chunk_rows = _pick_chunks(x)
    else:
        if x.ndim == 0 or x.shape[0] % n_chunks != 0:
            n_chunks, chunk_rows = 1, 0
        else:
            chunk_rows = x.shape[0] // n_chunks

    kernel = _make_hbm_copy_kernel(n_chunks, chunk_rows)
    return pl.pallas_call(
        kernel,
        out_shape=jax.ShapeDtypeStruct(x.shape, x.dtype),
        in_specs=[pl.BlockSpec(memory_space=pl.ANY)],
        out_specs=pl.BlockSpec(memory_space=pl.ANY),
        scratch_shapes=[pltpu.SemaphoreType.DMA((n_chunks,))],
        cost_estimate=pl.CostEstimate(
            flops=0, transcendentals=0, bytes_accessed=2 * x.nbytes
        ),
    )(x)


class PallasBaseModel:
    """JAX/Pallas analogue of the abstract PyTorch `Model` base class."""

    def __init__(self, copy_outputs: bool = False):
        # If True, get_outputs returns a physically distinct buffer (Pallas DMA
        # copy for large tensors).  Default False: pure identity pass-through.
        self.copy_outputs = copy_outputs
        self.populate_modules()

    def populate_modules(self):
        # nn.Parameter(torch.empty(0)) -> zero-size device-indicator param.
        self.device_indicator_param = jnp.zeros((0,), dtype=jnp.float32)

    @property
    def device(self):
        return next(iter(self.device_indicator_param.devices()))

    def get_outputs(self, x):
        # TODO(synk): `get_outputs` is @abstractmethod in the reference; the
        # base-class contract is a pass-through to a Dict.  The identity path
        # returns the input directly (zero HBM traffic); a Pallas HBM->HBM DMA
        # copy is used only when a distinct output buffer is requested.
        if self.copy_outputs:
            return {"output": _pallas_hbm_copy(x)}
        return {"output": x}

    def __call__(self, x):
        # forward(input) -> Dict[str, Tensor]
        return self.get_outputs(x)


if __name__ == "__main__":
    key = jax.random.PRNGKey(0)
    model = PallasBaseModel()

    # --- 1) Default forward: pure identity (no Pallas, no copy) -------------
    x = jax.random.normal(key, (2, 4, 16, 16), dtype=jnp.float32)
    y = model(x)["output"]
    jax.block_until_ready(y)
    assert y.shape == x.shape and y.dtype == x.dtype
    assert bool(jnp.all(y == x))

    # --- 2) Exercise the Pallas HBM->HBM DMA copy kernel (single DMA) -------
    y_copy = _pallas_hbm_copy(x, min_pallas_bytes=0)
    jax.block_until_ready(y_copy)
    assert y_copy.shape == x.shape and y_copy.dtype == x.dtype
    assert bool(jnp.all(y_copy == x))

    # Awkward (non 8*128-divisible) shape: whole-array DMA handles it as-is.
    x2 = jax.random.normal(jax.random.PRNGKey(1), (2, 3, 5, 7), dtype=jnp.float32)
    y2 = _pallas_hbm_copy(x2, min_pallas_bytes=0)
    jax.block_until_ready(y2)
    assert y2.shape == x2.shape and bool(jnp.all(y2 == x2))

    # --- 3) Exercise the concurrent-chunk DMA path (as used for huge copies)
    x3 = jax.random.normal(jax.random.PRNGKey(2), (8, 64, 128), dtype=jnp.float32)
    y3 = _pallas_hbm_copy(x3, min_pallas_bytes=0, n_chunks=4)
    jax.block_until_ready(y3)
    assert y3.shape == x3.shape and bool(jnp.all(y3 == x3))

    # --- 4) copy_outputs model path (small tensor -> XLA copy, no custom call)
    model_copy = PallasBaseModel(copy_outputs=True)
    y4 = model_copy(x)["output"]
    jax.block_until_ready(y4)
    assert bool(jnp.all(y4 == x))

    print("KERNEL_OK")
</pallas_src>

<mosaic_0001>
module attributes {stable_mosaic.version = 11 : i64} {
  func.func @kernel(%arg0: memref<2x4x16x16xf32, #tpu.memory_space<any>>, %arg1: memref<2x4x16x16xf32, #tpu.memory_space<any>>, %arg2: memref<1x!tpu.dma_semaphore, #tpu.memory_space<semaphore_mem>>) attributes {dimension_semantics = [], scalar_prefetch = 0 : i64, scratch_operands = 1 : i64, tpu.core_type = #tpu.core_type<tc>} {
    %c0_i32 = arith.constant 0 : i32
    %0 = tpu.memref_slice %arg2[%c0_i32] : memref<1x!tpu.dma_semaphore, #tpu.memory_space<semaphore_mem>> -> memref<1x!tpu.dma_semaphore, #tpu.memory_space<semaphore_mem>>
    %1 = tpu.memref_squeeze %0 : memref<1x!tpu.dma_semaphore, #tpu.memory_space<semaphore_mem>> -> memref<!tpu.dma_semaphore, #tpu.memory_space<semaphore_mem>>
    tpu.enqueue_dma source(%arg0 : memref<2x4x16x16xf32, #tpu.memory_space<any>>) target(%arg1 : memref<2x4x16x16xf32, #tpu.memory_space<any>>) target_semaphore(%1 : memref<!tpu.dma_semaphore, #tpu.memory_space<semaphore_mem>>)
    %c0_i32_0 = arith.constant 0 : i32
    %2 = tpu.memref_slice %arg2[%c0_i32_0] : memref<1x!tpu.dma_semaphore, #tpu.memory_space<semaphore_mem>> -> memref<1x!tpu.dma_semaphore, #tpu.memory_space<semaphore_mem>>
    %3 = tpu.memref_squeeze %2 : memref<1x!tpu.dma_semaphore, #tpu.memory_space<semaphore_mem>> -> memref<!tpu.dma_semaphore, #tpu.memory_space<semaphore_mem>>
    tpu.wait_dma2 semaphore(%3 : memref<!tpu.dma_semaphore, #tpu.memory_space<semaphore_mem>>) src(%arg0 : memref<2x4x16x16xf32, #tpu.memory_space<any>>) dst(%arg1 : memref<2x4x16x16xf32, #tpu.memory_space<any>>)
    return
  }
}

</mosaic_0001>

<bundles_post_ra>
// kernel: tpu_custom_call.1
= control target key start
LH: loop header
LB: loop body
LE: loop exit
PB: predicated region body
PF: predicated region fallthrough
CT: control target
= control target key end

     0   :  { %s34_s12 = smov [#allocation2]   ;;  %s35_s13 = smov [#allocation3]   ;;  %s53_s0 = inlined_call_operand.hbm [shape: f32[2,4,16,16], index: 0, kind: input, shape index: {}]   ;;  %s54_s1 = inlined_call_operand.hbm [shape: f32[2,4,16,16], index: 1, kind: output, shape index: {}]  }
   0x1   :  { %s10_s8 = sshll.u32 %s53_s0, 4  ;;  %s12_s11 = sshll.u32 %s54_s1, 4  ;;  %s11_s8 = int_to_ptr.hbm [resolvable:$true] %s10_s8  ;;  %s13_s11 = int_to_ptr.hbm [resolvable:$true] %s12_s11 }
   0x2   :  { %s36_s14 = smov 0  }
   0x3   :  { %16 = dma.general %s11_s8, 2048, %s13_s11, %s34_s12, %s35_s13, [#allocation4], %s36_s14, 0  }
   0x4   :  { %32 = dma.done.wait [#allocation2], 2048 }
   0x5   :  { %33 = vsyncadd [#allocation2], 4294965248 }
   0x6   :  { %22 = vsyncmov [#allocation2] }
   0x9   :  { %s23_s15 = vpop.sfrf %22 }
   0xa   :  { %p28_p0 = scmp.ne.s32.totalorder %s23_s15, 0 }
   0xc   :  { %27 = shalt.err (%p28_p0)  }

</bundles_post_ra>
